<compile_context>
chip_gen: v7x
topology: tpu7x:2x2x1
jax: 0.10.0
libtpu: 0.0.40
codegen_flags: <defaults>
</compile_context>

<pallas_src>
import functools

import jax
import jax.numpy as jnp
from jax import lax
from jax.experimental import pallas as pl
from jax.experimental.pallas import tpu as pltpu

EPS = 1e-5
LANES = 128


def _round_up(a, b):
    return (a + b - 1) // b * b


def _vmem_capacity_bytes():
    """Per-TensorCore VMEM capacity; falls back to the v7x (smallest) value."""
    try:
        cap = int(pltpu.get_tpu_info().vmem_capacity_bytes)
        if cap > 0:
            return cap
    except Exception:
        pass
    return 64 << 20


def _fold_pack_groups(v, pack, feat):
    """(1, pack*feat) per-lane partials -> per-feature totals in EVERY lane.

    Because the lane count is exactly pack*feat, sum_k roll(v, k*feat) places
    the full group sum for feature (j % feat) into every lane j (XLU rolls,
    off the VPU critical path).
    """
    if pack == 1:
        return v
    out = v
    for k in range(1, pack):
        out = out + pltpu.roll(v, shift=k * feat, axis=1)
    return out


# ---------------------------------------------------------------------------
# Resident-VMEM fast path: stats + normalize in one kernel, x read once.
# ---------------------------------------------------------------------------
def _resident_kernel(x_ref, gamma_ref, beta_ref, o_ref, *, n_samples, pack,
                     feat, eps):
    x = x_ref[...].astype(jnp.float32)                     # (rows, Fp)
    inv_m = jnp.float32(1.0 / n_samples)
    s = _fold_pack_groups(jnp.sum(x, axis=0, keepdims=True), pack, feat)
    mean = s * inv_m                                       # per-feature, tiled
    d = x - mean
    q = _fold_pack_groups(jnp.sum(d * d, axis=0, keepdims=True), pack, feat)
    var = q * inv_m                                        # exact biased var
    inv_std = lax.rsqrt(var + eps)                         # EUP
    scale = gamma_ref[...].astype(jnp.float32) * inv_std
    shift = beta_ref[...].astype(jnp.float32) - mean * scale
    o_ref[...] = (x * scale + shift).astype(o_ref.dtype)


# ---------------------------------------------------------------------------
# Streaming pass 1: per-lane sum / sum-of-squares, one partial per row-chunk.
# ---------------------------------------------------------------------------
def _stats_kernel(x_ref, out_ref, acc_sum, acc_sq, *, tile, steps, valid_rows,
                  total_tiles, padded_tiles):
    c = pl.program_id(0)          # row chunk ("parallel": one per TC on v7x)
    j = pl.program_id(1)          # step within the chunk ("arbitrary")
    t = c * steps + j             # logical row-tile index

    @pl.when(j == 0)
    def _():
        acc_sum[...] = jnp.zeros_like(acc_sum)
        acc_sq[...] = jnp.zeros_like(acc_sq)

    x = x_ref[...].astype(jnp.float32)

    def accumulate(xv):
        acc_sum[...] += jnp.sum(xv, axis=0, keepdims=True)
        acc_sq[...] += jnp.sum(xv * xv, axis=0, keepdims=True)

    # Mask only where needed (last real tile / padding tiles of an uneven
    # chunk split); all interior tiles take the unmasked path.
    needs_mask = (valid_rows % tile != 0) or (padded_tiles != total_tiles)
    if needs_mask:
        @pl.when(t >= total_tiles - 1)
        def _():
            row_ids = t * tile + lax.broadcasted_iota(jnp.int32, x.shape, 0)
            accumulate(jnp.where(row_ids < valid_rows, x, 0.0))

        @pl.when(t < total_tiles - 1)
        def _():
            accumulate(x)
    else:
        accumulate(x)

    @pl.when(j == steps - 1)
    def _():
        out_ref[0:1, :] = acc_sum[...]
        out_ref[1:2, :] = acc_sq[...]


# ---------------------------------------------------------------------------
# Streaming pass 2: y = x * scale + shift (single FMA per element).
# ---------------------------------------------------------------------------
def _normalize_kernel(x_ref, scale_ref, shift_ref, o_ref):
    y = x_ref[...].astype(jnp.float32) * scale_ref[...] + shift_ref[...]
    o_ref[...] = y.astype(o_ref.dtype)


def batch_norm_point(x, gamma, beta, *, tm=4096, eps=EPS,
                     resident_max_bytes=None):
    """x: (B, N, F); gamma, beta: (F,). Returns (B, N, F)."""
    assert x.ndim == 3
    B, N, F = x.shape
    assert gamma.shape == (F,) and beta.shape == (F,)
    M = B * N

    capacity = _vmem_capacity_bytes()
    if resident_max_bytes is None:
        # ~24 MiB on v7x (64 MiB VMEM/TC), ~48 MiB on v5e/v6e (128 MiB).
        resident_max_bytes = capacity * 3 // 8
    stream_vmem_limit = min(32 << 20, capacity // 2)
    resident_vmem_limit = capacity // 2

    # Lane packing: fold `pack` consecutive samples into one 128-lane row,
    # but only when it is a *free* view (M divisible by pack) -- no jnp.pad.
    pack = LANES // F if (0 < F <= LANES and LANES % F == 0) else 1
    if pack > 1 and M % pack != 0:
        pack = 1
    rows, Fp = M // pack, pack * F

    xr = x.reshape(rows, Fp)            # free view (contiguous row-major)

    # ------------------- resident single-kernel fast path -------------------
    # Budget: input + output slabs (lane-padded, double-buffered) + f32 temp.
    slab = _round_up(rows, 8) * _round_up(Fp, LANES) * 4
    if 5 * slab <= resident_max_bytes:
        gamma_t = jnp.tile(gamma.astype(jnp.float32), pack).reshape(1, Fp)
        beta_t = jnp.tile(beta.astype(jnp.float32), pack).reshape(1, Fp)
        out = pl.pallas_call(
            functools.partial(_resident_kernel, n_samples=M, pack=pack,
                              feat=F, eps=eps),
            out_shape=jax.ShapeDtypeStruct((rows, Fp), x.dtype),
            grid=(1,),
            in_specs=[pl.BlockSpec((rows, Fp), lambda i: (0, 0)),
                      pl.BlockSpec((1, Fp), lambda i: (0, 0)),
                      pl.BlockSpec((1, Fp), lambda i: (0, 0))],
            out_specs=pl.BlockSpec((rows, Fp), lambda i: (0, 0)),
            compiler_params=pltpu.CompilerParams(
                vmem_limit_bytes=resident_vmem_limit),
        )(xr, gamma_t, beta_t)
        return out.reshape(B, N, F)

    # --------------------------- streaming 2-pass ---------------------------
    tm = max(8, int(tm)) // 8 * 8
    # keep pass-2 double-buffered blocks well inside the explicit VMEM limit
    max_tile = max(8, (stream_vmem_limit // (20 * Fp)) // 8 * 8)
    tm = min(tm, max_tile)
    tile = rows if rows <= tm else tm
    total_tiles = pl.cdiv(rows, tile)
    num_chunks = 2 if total_tiles >= 2 else 1   # v7x: one row-chunk per TC
    steps = pl.cdiv(total_tiles, num_chunks)
    padded_tiles = num_chunks * steps

    # pass 1: per-chunk partial sums / sums-of-squares.
    stats = pl.pallas_call(
        functools.partial(_stats_kernel, tile=tile, steps=steps,
                          valid_rows=rows, total_tiles=total_tiles,
                          padded_tiles=padded_tiles),
        out_shape=jax.ShapeDtypeStruct((num_chunks, 2, Fp), jnp.float32),
        grid=(num_chunks, steps),
        in_specs=[pl.BlockSpec(
            (tile, Fp),
            lambda c, j: (jnp.minimum(c * steps + j, total_tiles - 1), 0))],
        out_specs=pl.BlockSpec((None, 2, Fp), lambda c, j: (c, 0, 0)),
        scratch_shapes=[pltpu.VMEM((1, Fp), jnp.float32),
                        pltpu.VMEM((1, Fp), jnp.float32)],
        compiler_params=pltpu.CompilerParams(
            dimension_semantics=("parallel", "arbitrary"),
            vmem_limit_bytes=stream_vmem_limit),
    )(xr)

    # Tiny glue (<= num_chunks*2*Fp floats): fold per-chunk partials and
    # packed lane groups back to per-feature stats, precompute scale/shift so
    # pass 2 is a single FMA per element.
    inv_m = jnp.float32(1.0 / M)
    s = jnp.sum(stats[:, 0, :], axis=0).reshape(pack, F).sum(axis=0)
    q = jnp.sum(stats[:, 1, :], axis=0).reshape(pack, F).sum(axis=0)
    mean = s * inv_m
    var = jnp.maximum(q * inv_m - mean * mean, 0.0)   # biased variance
    inv_std = lax.rsqrt(var + eps)
    scale = gamma.astype(jnp.float32) * inv_std
    shift = beta.astype(jnp.float32) - mean * scale
    scale_p = jnp.tile(scale, pack).reshape(1, Fp)
    shift_p = jnp.tile(shift, pack).reshape(1, Fp)

    # pass 2: streaming normalize.  Boundary (partial) output blocks are
    # write-masked by Pallas, so no pad/slice copies are needed for ragged M.
    out = pl.pallas_call(
        _normalize_kernel,
        out_shape=jax.ShapeDtypeStruct((rows, Fp), x.dtype),
        grid=(total_tiles,),
        in_specs=[pl.BlockSpec((tile, Fp), lambda i: (i, 0)),
                  pl.BlockSpec((1, Fp), lambda i: (0, 0)),
                  pl.BlockSpec((1, Fp), lambda i: (0, 0))],
        out_specs=pl.BlockSpec((tile, Fp), lambda i: (i, 0)),
        compiler_params=pltpu.CompilerParams(
            dimension_semantics=("parallel",),
            vmem_limit_bytes=stream_vmem_limit),
    )(xr, scale_p, shift_p)

    return out.reshape(B, N, F)


def _reference(x, gamma, beta, eps=EPS):
    B, N, F = x.shape
    x2 = x.reshape(B * N, F).astype(jnp.float32)
    mean = jnp.mean(x2, axis=0, keepdims=True)
    var = jnp.mean((x2 - mean) ** 2, axis=0, keepdims=True)
    y = (x2 - mean) / jnp.sqrt(var + eps) * gamma[None, :] + beta[None, :]
    return y.reshape(B, N, F).astype(x.dtype)


if __name__ == "__main__":
    key = jax.random.PRNGKey(0)
    k1, k2, k3 = jax.random.split(key, 3)

    F = 32
    gamma = 1.0 + 0.1 * jax.random.normal(k2, (F,), dtype=jnp.float32)
    beta = 0.1 * jax.random.normal(k3, (F,), dtype=jnp.float32)

    # 1) shipped shape (B=2, N=8, feat=32): resident path, lane-packed.
    x1 = jax.random.normal(k1, (2, 8, F), dtype=jnp.float32)
    o1 = batch_norm_point(x1, gamma, beta)
    jax.block_until_ready(o1)
    assert o1.shape == x1.shape
    assert jnp.allclose(o1, _reference(x1, gamma, beta), atol=1e-5, rtol=1e-5)

    # 2) ragged M (M=150, not a multiple of pack): resident path, zero copies.
    x2 = jax.random.normal(k1, (3, 50, F), dtype=jnp.float32)
    o2 = batch_norm_point(x2, gamma, beta)
    jax.block_until_ready(o2)
    assert jnp.allclose(o2, _reference(x2, gamma, beta), atol=1e-5, rtol=1e-5)

    # 3) forced streaming path, packed, 2-chunk stats sweep (v7x TC split).
    x3 = jax.random.normal(k1, (2, 64, F), dtype=jnp.float32)
    o3 = batch_norm_point(x3, gamma, beta, tm=8, resident_max_bytes=0)
    jax.block_until_ready(o3)
    assert jnp.allclose(o3, _reference(x3, gamma, beta), atol=1e-5, rtol=1e-5)

    # 4) forced streaming path, ragged M -> unpacked + masked grid tail.
    x4 = jax.random.normal(k1, (3, 50, F), dtype=jnp.float32)
    o4 = batch_norm_point(x4, gamma, beta, tm=16, resident_max_bytes=0)
    jax.block_until_ready(o4)
    assert jnp.allclose(o4, _reference(x4, gamma, beta), atol=1e-5, rtol=1e-5)

    print("KERNEL_OK")
</pallas_src>

<mosaic_0001>
module attributes {stable_mosaic.version = 11 : i64} {
  func.func @_resident_kernel(%arg0: i32, %arg1: memref<4x128xf32, #tpu.memory_space<vmem>>, %arg2: memref<1x128xf32, #tpu.memory_space<vmem>>, %arg3: memref<1x128xf32, #tpu.memory_space<vmem>>, %arg4: memref<4x128xf32, #tpu.memory_space<vmem>>) attributes {dimension_semantics = [#tpu.dimension_semantics<arbitrary>], iteration_bounds = array<i64: 1>, scalar_prefetch = 0 : i64, scratch_operands = 0 : i64, tpu.core_type = #tpu.core_type<tc>, window_params = [{pipeline_mode = #tpu.pipeline_mode<synchronous>, transform_indices = @transform_0, window_bounds = array<i64: 4, 128>}, {pipeline_mode = #tpu.pipeline_mode<synchronous>, transform_indices = @transform_1, window_bounds = array<i64: 1, 128>}, {pipeline_mode = #tpu.pipeline_mode<synchronous>, transform_indices = @transform_2, window_bounds = array<i64: 1, 128>}, {pipeline_mode = #tpu.pipeline_mode<synchronous>, transform_indices = @transform_3, window_bounds = array<i64: 4, 128>}]} {
    %c0 = arith.constant 0 : index
    %c0_0 = arith.constant 0 : index
    %0 = vector.load %arg1[%c0, %c0_0] : memref<4x128xf32, #tpu.memory_space<vmem>>, vector<4x128xf32>
    %cst = arith.constant dense<0.000000e+00> : vector<128xf32>
    %1 = vector.multi_reduction <add>, %0, %cst [0] : vector<4x128xf32> to vector<128xf32>
    %2 = vector.shape_cast %1 : vector<128xf32> to vector<1x128xf32>
    %c32_i32 = arith.constant 32 : i32
    %3 = tpu.dynamic_rotate %2 by %c32_i32 dim 1 : vector<1x128xf32>, i32 -> vector<1x128xf32>
    %4 = arith.addf %2, %3 : vector<1x128xf32>
    %c64_i32 = arith.constant 64 : i32
    %5 = tpu.dynamic_rotate %2 by %c64_i32 dim 1 : vector<1x128xf32>, i32 -> vector<1x128xf32>
    %6 = arith.addf %4, %5 : vector<1x128xf32>
    %c96_i32 = arith.constant 96 : i32
    %7 = tpu.dynamic_rotate %2 by %c96_i32 dim 1 : vector<1x128xf32>, i32 -> vector<1x128xf32>
    %8 = arith.addf %6, %7 : vector<1x128xf32>
    %cst_1 = arith.constant 6.250000e-02 : f32
    %9 = vector.broadcast %cst_1 : f32 to vector<1x128xf32>
    %10 = arith.mulf %8, %9 : vector<1x128xf32>
    %11 = vector.broadcast %10 : vector<1x128xf32> to vector<4x128xf32>
    %12 = arith.subf %0, %11 : vector<4x128xf32>
    %13 = arith.mulf %12, %12 : vector<4x128xf32>
    %cst_2 = arith.constant dense<0.000000e+00> : vector<128xf32>
    %14 = vector.multi_reduction <add>, %13, %cst_2 [0] : vector<4x128xf32> to vector<128xf32>
    %15 = vector.shape_cast %14 : vector<128xf32> to vector<1x128xf32>
    %c32_i32_3 = arith.constant 32 : i32
    %16 = tpu.dynamic_rotate %15 by %c32_i32_3 dim 1 : vector<1x128xf32>, i32 -> vector<1x128xf32>
    %17 = arith.addf %15, %16 : vector<1x128xf32>
    %c64_i32_4 = arith.constant 64 : i32
    %18 = tpu.dynamic_rotate %15 by %c64_i32_4 dim 1 : vector<1x128xf32>, i32 -> vector<1x128xf32>
    %19 = arith.addf %17, %18 : vector<1x128xf32>
    %c96_i32_5 = arith.constant 96 : i32
    %20 = tpu.dynamic_rotate %15 by %c96_i32_5 dim 1 : vector<1x128xf32>, i32 -> vector<1x128xf32>
    %21 = arith.addf %19, %20 : vector<1x128xf32>
    %cst_6 = arith.constant 6.250000e-02 : f32
    %22 = vector.broadcast %cst_6 : f32 to vector<1x128xf32>
    %23 = arith.mulf %21, %22 : vector<1x128xf32>
    %cst_7 = arith.constant 9.99999974E-6 : f32
    %24 = vector.broadcast %cst_7 : f32 to vector<1x128xf32>
    %25 = arith.addf %23, %24 : vector<1x128xf32>
    %26 = math.rsqrt %25 : vector<1x128xf32>
    %c0_8 = arith.constant 0 : index
    %c0_9 = arith.constant 0 : index
    %27 = vector.load %arg2[%c0_8, %c0_9] : memref<1x128xf32, #tpu.memory_space<vmem>>, vector<1x128xf32>
    %28 = arith.mulf %27, %26 : vector<1x128xf32>
    %c0_10 = arith.constant 0 : index
    %c0_11 = arith.constant 0 : index
    %29 = vector.load %arg3[%c0_10, %c0_11] : memref<1x128xf32, #tpu.memory_space<vmem>>, vector<1x128xf32>
    %30 = arith.mulf %10, %28 : vector<1x128xf32>
    %31 = arith.subf %29, %30 : vector<1x128xf32>
    %32 = vector.broadcast %28 : vector<1x128xf32> to vector<4x128xf32>
    %33 = arith.mulf %0, %32 : vector<4x128xf32>
    %34 = vector.broadcast %31 : vector<1x128xf32> to vector<4x128xf32>
    %35 = arith.addf %33, %34 : vector<4x128xf32>
    %c0_12 = arith.constant 0 : index
    %c0_13 = arith.constant 0 : index
    %36 = vector.load %arg4[%c0_12, %c0_13] : memref<4x128xf32, #tpu.memory_space<vmem>>, vector<4x128xf32>
    tpu.vector_store %arg4[%c0_12, %c0_13], %35 {strides = array<i32>} : memref<4x128xf32, #tpu.memory_space<vmem>>, vector<4x128xf32>,
    return
  }
  func.func @transform_0(%arg0: i32) -> (i32, i32) {
    %c0_i32 = arith.constant 0 : i32
    %c0_i32_0 = arith.constant 0 : i32
    %c0_i32_1 = arith.constant 0 : i32
    return %c0_i32, %c0_i32_0 : i32, i32
  }
  func.func @transform_1(%arg0: i32) -> (i32, i32) {
    %c0_i32 = arith.constant 0 : i32
    %c0_i32_0 = arith.constant 0 : i32
    %c0_i32_1 = arith.constant 0 : i32
    return %c0_i32, %c0_i32_0 : i32, i32
  }
  func.func @transform_2(%arg0: i32) -> (i32, i32) {
    %c0_i32 = arith.constant 0 : i32
    %c0_i32_0 = arith.constant 0 : i32
    %c0_i32_1 = arith.constant 0 : i32
    return %c0_i32, %c0_i32_0 : i32, i32
  }
  func.func @transform_3(%arg0: i32) -> (i32, i32) {
    %c0_i32 = arith.constant 0 : i32
    %c0_i32_0 = arith.constant 0 : i32
    %c0_i32_1 = arith.constant 0 : i32
    return %c0_i32, %c0_i32_0 : i32, i32
  }
}

</mosaic_0001>

<bundles_post_ra>
// kernel: tpu_custom_call.1
= control target key start
LH: loop header
LB: loop body
LE: loop exit
PB: predicated region body
PF: predicated region fallthrough
CT: control target
= control target key end

     0   :  { %8 = vsyncpa [#allocation3], 0  ;;  %s218_s0 = inlined_call_operand.hbm [shape: f32[4,128], index: 0, kind: input, shape index: {}]   ;;  %s219_s1 = inlined_call_operand.vmem [shape: f32[1,128], index: 1, kind: input, shape index: {}]   ;;  %s220_s2 = inlined_call_operand.vmem [shape: f32[1,128], index: 2, kind: input, shape index: {}]   ;;  %s221_s3 = inlined_call_operand.hbm [shape: f32[4,128], index: 3, kind: output, shape index: {}]  }
   0x1   :  { %9 = vsyncpa [#allocation4], 0  ;;  %s161_s12 = smov [#allocation2]   ;;  %s113_s16 = scalar_lea.hbm %s218_s0, 64 }
   0x2   :  { %s16_s13 = sshll.u32 %s161_s12, 4  ;;  %p114_p0 = scmp.ne.s32.totalorder %s218_s0, %s113_s16  ;;  %s17_s13 = int_to_ptr.vmem [resolvable:$true] %s16_s13 }
   0x3   :  { %p117_p1 = scmp.lt.u32.totalorder %s113_s16, %s218_s0 }
   0x5   :  { %p119_p2 = pnand %p117_p1, %p114_p0 }
   0x7   :  { %122 = shalt.err (!%p119_p2)
}
   0x8   :  { %s123_s21 = scalar_lea.vmem %s17_s13, 64  ;;  %p128_p4 = scmp.lt.s32.totalorder %s17_s13, %s17_s13 }
   0x9   :  { %p124_p3 = scmp.ne.s32.totalorder %s17_s13, %s123_s21  ;;  %p129_p5 = scmp.lt.s32.totalorder %s123_s21, %s123_s21 }
   0xb   :  { %p130_p6 = por %p129_p5, %p128_p4 }
   0xd   :  { %p131_p7 = pnand %p130_p6, %p124_p3 }
   0xf   :  { %134 = shalt.err (!%p131_p7)
}
  0x10   :  { %19 = dma.hbm_to_vmem [thread:$0]  %s218_s0, 64, %s17_s13, [#allocation3]  }
  0x11   :  { %157 = dma.done.wait [#allocation3], 64  }
  0x12   :  { %158 = vsyncadd [#allocation3], 4294967232  ;;  %vm28_vm0 = vcmask 1043456   ;;  %v27_v0 = vld [vmem:[#allocation2] sm:$0xf]  ;;  %s162_s24 = smov 32   ;;  %v46_v8 = vlaneseq }
  0x13   :  { %v29_v1 = vsel %vm28_vm0, %v27_v0, 0.0  ;;  %s163_s25 = smov 96   ;;  %s164_s26 = smov 64   ;;  %v71_v36 = vld [vmem:[%s219_s1] sm:$0x1] }
  0x14   :  { %v30_v2 = vrot.slane %v29_v1, 4  ;;  %v47_v11 = vshrl.u32 %v46_v8, 7  ;;  %v73_v39 = vld [vmem:[%s220_s2] sm:$0x1]  ;;  %s165_s30 = smov [#allocation5]  }
  0x15   :  { %s97_s4 = sshll.u32 %s165_s30, 4  ;;  %s98_s4 = int_to_ptr.vmem [resolvable:$true] %s97_s4 }
  0x16   :  { %v31_v3 = vadd.f32 %v30_v2, %v29_v1  ;;  %v48_v15 = vsub.s32 0, %v47_v11  ;;  %s135_s5 = scalar_lea.vmem %s98_s4, 64  ;;  %p140_p9 = scmp.lt.s32.totalorder %s98_s4, %s98_s4 }
  0x17   :  { %p136_p8 = scmp.ne.s32.totalorder %s98_s4, %s135_s5  ;;  %p141_p10 = scmp.lt.s32.totalorder %s135_s5, %s135_s5 }
  0x18   :  { %v32_v4 = vrot.slane %v31_v3, 2 }
  0x19   :  { %p142_p11 = por %p141_p10, %p140_p9 }
  0x1a   :  { %v33_v5 = vadd.f32 %v32_v4, %v31_v3 }
  0x1b   :  { %p143_p12 = pnand %p142_p11, %p136_p8 }
  0x1c   :  { %v34_v6 = vrot.slane %v33_v5, 1 }
  0x1e   :  { %v35_v7 = vadd.f32 %v34_v6, %v33_v5 }
  0x20   :  { %36 = vrot.lane.b32.xlu0 %v35_v7, %s162_s24  ;;  %42 = vrot.lane.b32.xlu1 %v35_v7, %s163_s25 }
  0x24   :  { %39 = vrot.lane.b32.xlu0 %v35_v7, %s164_s26 }
  0x92   :  { %v37_v9 = vpop.permute.xlu0 %36  ;;  %v43_v13 = vpop.permute.xlu1 %42 }
  0x93   :  { %v38_v10 = vadd.f32 %v37_v9, %v35_v7 }
  0x96   :  { %v40_v12 = vpop.permute.xlu0 %39 }
  0x97   :  { %v41_v14 = vadd.f32 %v40_v12, %v38_v10 }
  0x99   :  { %v44_v16 = vadd.f32 %v43_v13, %v41_v14 }
  0x9b   :  { %v45_v17 = vmul.f32 0.0625, %v44_v16 }
  0x9d   :  { %v49_v18 = vrot.slane %v45_v17, %v48_v15 }
  0x9f   :  { %v50_v19 = vsub.f32 %v27_v0, %v49_v18 }
  0xa1   :  { %v51_v20 = vmul.f32 %v50_v19, %v50_v19 }
  0xa3   :  { %v52_v21 = vsel %vm28_vm0, %v51_v20, 0.0 }
  0xa4   :  { %v53_v22 = vrot.slane %v52_v21, 4 }
  0xa6   :  { %v54_v23 = vadd.f32 %v53_v22, %v52_v21 }
  0xa8   :  { %v55_v24 = vrot.slane %v54_v23, 2 }
  0xaa   :  { %v56_v25 = vadd.f32 %v55_v24, %v54_v23 }
  0xac   :  { %v57_v26 = vrot.slane %v56_v25, 1 }
  0xae   :  { %v58_v27 = vadd.f32 %v57_v26, %v56_v25 }
  0xb0   :  { %62 = vrot.lane.b32.xlu0 %v58_v27, %s164_s26  ;;  %59 = vrot.lane.b32.xlu1 %v58_v27, %s162_s24 }
  0xb4   :  { %65 = vrot.lane.b32.xlu1 %v58_v27, %s163_s25 }
 0x122   :  { %v60_v28 = vpop.permute.xlu1 %59  ;;  %v63_v30 = vpop.permute.xlu0 %62 }
 0x123   :  { %v61_v29 = vadd.f32 %v60_v28, %v58_v27 }
 0x125   :  { %v64_v31 = vadd.f32 %v63_v30, %v61_v29 }
 0x126   :  { %v66_v32 = vpop.permute.xlu1 %65 }
 0x127   :  { %v67_v33 = vadd.f32 %v66_v32, %v64_v31 }
 0x129   :  { %v68_v34 = vmul.f32 0.0625, %v67_v33 }
 0x12b   :  { %v69_v35 = vadd.f32 1e-05, %v68_v34 }
 0x12d   :  { %111 = vrsqrt.f32 %v69_v35 }
 0x137   :  { %v112_v37 = vpop.eup %111 }
 0x138   :  { %v72_v38 = vmul.f32 %v112_v37, %v71_v36 }
 0x13a   :  { %v74_v40 = vmul.f32 %v72_v38, %v45_v17  ;;  %v80_v41 = vrot.slane %v72_v38, %v48_v15 }
 0x13c   :  { %v75_v42 = vsub.f32 %v73_v39, %v74_v40  ;;  %v82_v43 = vmul.f32 %v80_v41, %v27_v0 }
 0x13e   :  { %v87_v44 = vrot.slane %v75_v42, %v48_v15 }
 0x140   :  { %v89_v45 = vadd.f32 %v87_v44, %v82_v43 }
 0x142   :  { %90 = vst [vmem:[#allocation5] sm:$0xf] %v89_v45 }
 0x143   :  { %146 = shalt.err (!%p143_p12)
}
 0x144   :  { %s147_s2 = scalar_lea.hbm %s221_s3, 64 }
 0x145   :  { %p148_p13 = scmp.ne.s32.totalorder %s221_s3, %s147_s2  ;;  %p151_p0 = scmp.lt.u32.totalorder %s147_s2, %s221_s3 }
 0x147   :  { %p153_p1 = pnand %p151_p0, %p148_p13 }
 0x149   :  { %156 = shalt.err (!%p153_p1)
}
 0x14a   :  { %100 = dma.vmem_to_hbm [thread:$0]  %s98_s4, 64, %s221_s3, [#allocation4]  }
 0x14b   :  { %159 = dma.done.wait [#allocation4], 64  }
 0x14c   :  { %160 = vsyncadd [#allocation4], 4294967232 }
 0x14d   :  { %104 = vsyncpa [#allocation3], 1 }
 0x14e   :  { %105 = vsyncpa [#allocation4], 1 }

</bundles_post_ra>
